<compile_context>
chip_gen: v6e
topology: v6e:2x2x1
jax: 0.10.0
libtpu: 0.0.40
codegen_flags: <defaults>
</compile_context>

<pallas_src>
import functools

import jax
import jax.numpy as jnp
from jax.experimental import pallas as pl
from jax.experimental.pallas import tpu as pltpu


def _round_up(x, m):
    return ((x + m - 1) // m) * m


def _gaussian_smearing_kernel(coeff_ref, dist_ref, offset_ref, out_ref):
    # coeff_ref : SMEM (1, 1)                       scalar coefficient
    # edge-major path:  dist (TILE, 1), offset (1, NUM_RBF), out (TILE, NUM_RBF)
    # lane-dense path:  dist (1, TILE), offset (NUM_RBF, 1), out (NUM_RBF, TILE)
    # Same body for both: broadcasting does the right thing.  Compute stays in
    # the input dtype (f32); cast only at the store (v5e has no bf16 VPU/EUP).
    coeff = coeff_ref[0, 0]
    diff = dist_ref[...] - offset_ref[...]
    out_ref[...] = jnp.exp(coeff * diff * diff).astype(out_ref.dtype)


@functools.partial(
    jax.jit, static_argnames=("tile", "edge_major_output", "out_dtype"))
def gaussian_smearing(dist, offset, coeff, *, tile=4096,
                      edge_major_output=True, out_dtype=None):
    """dist: (N,), offset: (num_rbf,), coeff: scalar.

    Returns exp(coeff * (dist[:, None] - offset)**2).
    edge_major_output=True  (default): (N, num_rbf)  -- PyTorch layout,
        written directly by the kernel (no post-kernel transpose).
    edge_major_output=False: (num_rbf, N) lane-dense layout (preferred when
        the consumer can be adapted / fused; unmasked stores).
    out_dtype: e.g. jnp.bfloat16 to halve HBM write bytes (recommended on
        v6e/v7x if downstream tolerates it).
    """
    n = dist.shape[0]
    num_rbf = offset.shape[0]
    dtype = dist.dtype
    out_dtype = dtype if out_dtype is None else jnp.dtype(out_dtype)

    assert tile % 128 == 0, "tile must be a multiple of 128 (lane width)"
    # Size the tile from N; cap at ~N/2 so the grid has >= 2 "parallel" steps
    # (v7x shards the parallel grid axis across its 2 TensorCores), but never
    # below 128 and never above the requested tile.
    half = _round_up(pl.cdiv(n, 2), 128)
    t = max(128, min(tile, half))
    n_pad = _round_up(n, t)
    grid = (n_pad // t,)

    coeff2d = jnp.asarray(coeff, dtype=dtype).reshape(1, 1)

    itemsize_in = jnp.dtype(dtype).itemsize
    itemsize_out = jnp.dtype(out_dtype).itemsize
    cost = pl.CostEstimate(
        flops=3 * n_pad * num_rbf,                    # sub + mul + mul per elem
        transcendentals=n_pad * num_rbf,              # one exp per elem
        bytes_accessed=(n_pad * itemsize_in + num_rbf * itemsize_in
                        + n_pad * num_rbf * itemsize_out))

    compiler_params = pltpu.CompilerParams(dimension_semantics=("parallel",))

    # NOTE: padded distance entries are zero-filled, so padded rows/cols hold
    # exp(coeff * offset^2) in (0, 1] -- no Inf/NaN -- and are sliced off
    # below.  Do not remove the slice.
    if edge_major_output:
        # (N, num_rbf): distances on the sublane axis, offsets on the lane
        # axis; offset block uses a constant index map -> resident in VMEM.
        dist_col = jnp.zeros((n_pad, 1), dtype).at[:n, 0].set(dist)
        offset_row = offset.astype(dtype).reshape(1, num_rbf)
        out = pl.pallas_call(
            _gaussian_smearing_kernel,
            out_shape=jax.ShapeDtypeStruct((n_pad, num_rbf), out_dtype),
            grid_spec=pltpu.PrefetchScalarGridSpec(
                num_scalar_prefetch=0,
                grid=grid,
                in_specs=[
                    pl.BlockSpec((1, 1), lambda i: (0, 0),
                                 memory_space=pltpu.MemorySpace.SMEM),
                    pl.BlockSpec((t, 1), lambda i: (i, 0)),
                    pl.BlockSpec((1, num_rbf), lambda i: (0, 0)),
                ],
                out_specs=pl.BlockSpec((t, num_rbf), lambda i: (i, 0)),
            ),
            compiler_params=compiler_params,
            cost_estimate=cost,
        )(coeff2d, dist_col, offset_row)
        return out if n_pad == n else out[:n]

    # Lane-dense (num_rbf, N): distances on the lane axis -> unmasked stores.
    dist_row = jnp.zeros((1, n_pad), dtype).at[0, :n].set(dist)
    offset_col = offset.astype(dtype).reshape(num_rbf, 1)
    out_t = pl.pallas_call(
        _gaussian_smearing_kernel,
        out_shape=jax.ShapeDtypeStruct((num_rbf, n_pad), out_dtype),
        grid_spec=pltpu.PrefetchScalarGridSpec(
            num_scalar_prefetch=0,
            grid=grid,
            in_specs=[
                pl.BlockSpec((1, 1), lambda i: (0, 0),
                             memory_space=pltpu.MemorySpace.SMEM),
                pl.BlockSpec((1, t), lambda i: (0, i)),
                pl.BlockSpec((num_rbf, 1), lambda i: (0, 0)),
            ],
            out_specs=pl.BlockSpec((num_rbf, t), lambda i: (0, i)),
        ),
        compiler_params=compiler_params,
        cost_estimate=cost,
    )(coeff2d, dist_row, offset_col)
    return out_t if n_pad == n else out_t[:, :n]


def make_params(cutoff_lower=0.0, cutoff_upper=5.0, num_rbf=50,
                dtype=jnp.float32):
    """Deterministic parameter init matching GaussianSmearing._initial_params."""
    offset = jnp.linspace(cutoff_lower, cutoff_upper, num_rbf, dtype=dtype)
    coeff = -0.5 / (offset[1] - offset[0]) ** 2
    return offset, coeff


if __name__ == "__main__":
    key = jax.random.PRNGKey(0)

    cutoff_lower, cutoff_upper, num_rbf = 0.0, 5.0, 50
    offset, coeff = make_params(cutoff_lower, cutoff_upper, num_rbf)

    # Example "distances": 300 edges (deliberately NOT a multiple of 128 so the
    # wrapper-side padding + >=2-step grid path is exercised).
    n_edges = 300
    dist = jax.random.uniform(key, (n_edges,), dtype=jnp.float32,
                              minval=cutoff_lower, maxval=cutoff_upper)

    # Pure-JAX reference (same math as the PyTorch forward).
    ref = jnp.exp(coeff * (dist[:, None] - offset[None, :]) ** 2)

    # Default (PyTorch-layout) path: (N, num_rbf), no post-kernel transpose.
    out = jax.block_until_ready(gaussian_smearing(dist, offset, coeff))
    assert out.shape == (n_edges, num_rbf)
    assert out.dtype == jnp.float32
    assert jnp.allclose(out, ref, atol=1e-6, rtol=1e-6)

    # Lane-dense layout path (for fused consumers).
    out_t = jax.block_until_ready(
        gaussian_smearing(dist, offset, coeff, edge_major_output=False))
    assert out_t.shape == (num_rbf, n_edges)
    assert jnp.allclose(out_t.T, ref, atol=1e-6, rtol=1e-6)

    # bf16 output path (halves HBM writeback on v6e/v7x); f32 math inside.
    out_bf16 = jax.block_until_ready(
        gaussian_smearing(dist, offset, coeff, out_dtype=jnp.bfloat16))
    assert out_bf16.shape == (n_edges, num_rbf)
    assert out_bf16.dtype == jnp.bfloat16
    assert jnp.allclose(out_bf16.astype(jnp.float32), ref, atol=1e-2, rtol=1e-2)

    print("KERNEL_OK")
</pallas_src>

<mosaic_0001>
module attributes {stable_mosaic.version = 11 : i64} {
  func.func @_gaussian_smearing_kernel(%arg0: i32, %arg1: memref<1x1xf32, #tpu.memory_space<smem>>, %arg2: memref<256x1xf32, #tpu.memory_space<vmem>>, %arg3: memref<1x50xf32, #tpu.memory_space<vmem>>, %arg4: memref<256x50xf32, #tpu.memory_space<vmem>>) attributes {dimension_semantics = [#tpu.dimension_semantics<parallel>], iteration_bounds = array<i64: 2>, scalar_prefetch = 0 : i64, scratch_operands = 0 : i64, tpu.core_type = #tpu.core_type<tc>, window_params = [{transform_indices = @transform_0, window_bounds = array<i64: 1, 1>}, {transform_indices = @transform_1, window_bounds = array<i64: 256, 1>}, {pipeline_mode = #tpu.pipeline_mode<synchronous>, transform_indices = @transform_2, window_bounds = array<i64: 1, 50>}, {transform_indices = @transform_3, window_bounds = array<i64: 256, 50>}]} {
    %c0 = arith.constant 0 : index
    %c0_0 = arith.constant 0 : index
    %0 = memref.load %arg1[%c0, %c0_0] : memref<1x1xf32, #tpu.memory_space<smem>>
    %c0_1 = arith.constant 0 : index
    %c0_2 = arith.constant 0 : index
    %1 = vector.load %arg2[%c0_1, %c0_2] : memref<256x1xf32, #tpu.memory_space<vmem>>, vector<256x1xf32>
    %c0_3 = arith.constant 0 : index
    %c0_4 = arith.constant 0 : index
    %2 = vector.load %arg3[%c0_3, %c0_4] : memref<1x50xf32, #tpu.memory_space<vmem>>, vector<1x50xf32>
    %3 = vector.broadcast %1 : vector<256x1xf32> to vector<256x50xf32>
    %4 = vector.broadcast %2 : vector<1x50xf32> to vector<256x50xf32>
    %5 = arith.subf %3, %4 : vector<256x50xf32>
    %6 = vector.broadcast %0 : f32 to vector<256x50xf32>
    %7 = arith.mulf %6, %5 : vector<256x50xf32>
    %8 = arith.mulf %7, %5 : vector<256x50xf32>
    %9 = math.exp %8 : vector<256x50xf32>
    %c0_5 = arith.constant 0 : index
    %c0_6 = arith.constant 0 : index
    %10 = vector.load %arg4[%c0_5, %c0_6] : memref<256x50xf32, #tpu.memory_space<vmem>>, vector<256x50xf32>
    tpu.vector_store %arg4[%c0_5, %c0_6], %9 {strides = array<i32>} : memref<256x50xf32, #tpu.memory_space<vmem>>, vector<256x50xf32>,
    return
  }
  func.func @transform_0(%arg0: i32) -> (i32, i32) {
    %c0_i32 = arith.constant 0 : i32
    %c0_i32_0 = arith.constant 0 : i32
    %c0_i32_1 = arith.constant 0 : i32
    return %c0_i32, %c0_i32_0 : i32, i32
  }
  func.func @transform_1(%arg0: i32) -> (i32, i32) {
    %c0_i32 = arith.constant 0 : i32
    %c0_i32_0 = arith.constant 0 : i32
    return %arg0, %c0_i32 : i32, i32
  }
  func.func @transform_2(%arg0: i32) -> (i32, i32) {
    %c0_i32 = arith.constant 0 : i32
    %c0_i32_0 = arith.constant 0 : i32
    %c0_i32_1 = arith.constant 0 : i32
    return %c0_i32, %c0_i32_0 : i32, i32
  }
  func.func @transform_3(%arg0: i32) -> (i32, i32) {
    %c0_i32 = arith.constant 0 : i32
    %c0_i32_0 = arith.constant 0 : i32
    return %arg0, %c0_i32 : i32, i32
  }
}

</mosaic_0001>

<bundles_post_ra>
// kernel: gaussian_smearing.1
= control target key start
LH: loop header
LB: loop body
LE: loop exit
PB: predicated region body
PF: predicated region fallthrough
CT: control target
= control target key end

     0   :  { %s744_s14 = smov 0   ;;  %s939_s0 = inlined_call_operand.<no memory space> [shape: f32[1,1], index: 0, kind: input, shape index: {}]   ;;  %s940_s1 = inlined_call_operand.vmem [shape: f32[512,1], index: 1, kind: input, shape index: {}]   ;;  %s941_s2 = inlined_call_operand.vmem [shape: f32[1,50], index: 2, kind: input, shape index: {}]   ;;  %s942_s3 = inlined_call_operand.vmem [shape: f32[512,50], index: 3, kind: output, shape index: {}]  }
   0x1   :  { %8 = sst [smem:[#allocation2]] %s939_s0 }
   0x2 LB: > { %s625_s15 = sadd.s32 4294967295, %s718_s14   ;;  %p629_p0 = scmp.ge.s32.totalorder %s718_s14, 1  ;;  %s718_s14 = sphi %s744_s14, %s14_s14  }
   0x3   : > { %p139_p1 = scmp.lt.s32.totalorder %s718_s14, 3 }
   0x5   : > { %p140_p2 = pnand %p629_p0, %p139_p1 }
   0x6   : > { %s630_s16 = sshll.u32 (!%p140_p2), %s625_s15, 5  ;;  %s175_s20 = sld [smem:[#allocation2]] (!%p140_p2) }
   0x7   : > { %143 = sbr.rel (%p140_p2) target bundleno = 224 (0xe0), region = 32  ;;  %p164_p3 = scmp.lt.s32.totalorder (!%p140_p2), %s630_s16, 63 }
   0xc   : > { %v720_v0 = vmov 0   ;;  %s944_s16 = smov (!%p164_p3, %s630_s16), 63  ;;  %v797_v33 = vld [vmem:[%s941_s2] ss:$0 sm:$0xff]  ;;  %v799_v34 = vstv %s175_s20  ;;  %vm536_vm0 = vcmask 408576  }
   0xd   : > { %647 = vset.pattern.permute.xlu1 %v720_v0  ;;  %646 = vset.pattern.permute.xlu0 %v720_v0  ;;  %s631_s0 = sshll.u32 %s944_s16, 3 }
   0xe   : > { %s760_s19 = scalar_lea.vmem %s940_s1, %s631_s0  ;;  %s825_s25 = scalar_lea.vmem %s942_s3, %s631_s0 }
   0xf   : > { %v178_v1 = vld [vmem:[%s760_s19 + $0x10] sm:$0xff]  ;;  %v176_v2 = vld [vmem:[%s760_s19] sm:$0xff]  ;;  %v179_v3 = vld [vmem:[%s760_s19 + $0x18] sm:$0xff] }
  0x10   : > { %221 = vperm.xlu1 %647, %v178_v1   ;;  %211 = vperm.xlu0 %646, %v176_v2   ;;  %v177_v4 = vld [vmem:[%s760_s19 + $0x8] sm:$0xff]  ;;  %v180_v6 = vld [vmem:[%s760_s19 + $0x20] sm:$0xff]  ;;  %v183_v7 = vld [vmem:[%s760_s19 + $0x38] sm:$0xff] }
  0x11   : > { %v181_v5 = vld [vmem:[%s760_s19 + $0x28] sm:$0xff]  ;;  %v182_v8 = vld [vmem:[%s760_s19 + $0x30] sm:$0xff]  ;;  %v184_v10 = vld [vmem:[%s760_s19 + $0x40] sm:$0xff] }
  0x12   : > { %v185_v9 = vld [vmem:[%s760_s19 + $0x48] sm:$0xff]  ;;  %v187_v11 = vld [vmem:[%s760_s19 + $0x58] sm:$0xff]  ;;  %v186_v12 = vld [vmem:[%s760_s19 + $0x50] sm:$0xff] }
  0x13   : > { %v189_v13 = vld [vmem:[%s760_s19 + $0x68] sm:$0xff]  ;;  %v188_v14 = vld [vmem:[%s760_s19 + $0x60] sm:$0xff]  ;;  %v191_v15 = vld [vmem:[%s760_s19 + $0x78] sm:$0xff] }
  0x14   : > { %226 = vperm.xlu1 %647, %v179_v3   ;;  %216 = vperm.xlu0 %646, %v177_v4   ;;  %v190_v16 = vld [vmem:[%s760_s19 + $0x70] sm:$0xff]  ;;  %v193_v17 = vld [vmem:[%s760_s19 + $0x88] sm:$0xff]  ;;  %v192_v18 = vld [vmem:[%s760_s19 + $0x80] sm:$0xff] }
  0x15   : > { %v195_v19 = vld [vmem:[%s760_s19 + $0x98] sm:$0xff]  ;;  %v194_v20 = vld [vmem:[%s760_s19 + $0x90] sm:$0xff]  ;;  %v197_v21 = vld [vmem:[%s760_s19 + $0xa8] sm:$0xff] }
  0x16   : > { %v196_v22 = vld [vmem:[%s760_s19 + $0xa0] sm:$0xff]  ;;  %v199_v23 = vld [vmem:[%s760_s19 + $0xb8] sm:$0xff]  ;;  %v198_v24 = vld [vmem:[%s760_s19 + $0xb0] sm:$0xff] }
  0x17   : > { %v201_v25 = vld [vmem:[%s760_s19 + $0xc8] sm:$0xff]  ;;  %v200_v26 = vld [vmem:[%s760_s19 + $0xc0] sm:$0xff]  ;;  %v203_v27 = vld [vmem:[%s760_s19 + $0xd8] sm:$0xff] }
  0x18   : > { %236 = vperm.xlu1 %647, %v181_v5   ;;  %231 = vperm.xlu0 %646, %v180_v6   ;;  %v202_v28 = vld [vmem:[%s760_s19 + $0xd0] sm:$0xff]  ;;  %v205_v29 = vld [vmem:[%s760_s19 + $0xe8] sm:$0xff]  ;;  %v204_v30 = vld [vmem:[%s760_s19 + $0xe0] sm:$0xff] }
  0x19   : > { %v207_v31 = vld [vmem:[%s760_s19 + $0xf8] sm:$0xff]  ;;  %v206_v32 = vld [vmem:[%s760_s19 + $0xf0] sm:$0xff] }
  0x1c   : > { %246 = vperm.xlu1 %647, %v183_v7   ;;  %241 = vperm.xlu0 %646, %v182_v8  }
  0x20   : > { %256 = vperm.xlu1 %647, %v185_v9   ;;  %251 = vperm.xlu0 %646, %v184_v10  }
  0x24   : > { %266 = vperm.xlu1 %647, %v187_v11   ;;  %261 = vperm.xlu0 %646, %v186_v12  }
  0x28   : > { %276 = vperm.xlu1 %647, %v189_v13   ;;  %271 = vperm.xlu0 %646, %v188_v14  }
  0x2c   : > { %286 = vperm.xlu1 %647, %v191_v15   ;;  %281 = vperm.xlu0 %646, %v190_v16  }
  0x30   : > { %296 = vperm.xlu1 %647, %v193_v17   ;;  %291 = vperm.xlu0 %646, %v192_v18  }
  0x34   : > { %306 = vperm.xlu1 %647, %v195_v19   ;;  %301 = vperm.xlu0 %646, %v194_v20  }
  0x38   : > { %316 = vperm.xlu1 %647, %v197_v21   ;;  %311 = vperm.xlu0 %646, %v196_v22  }
  0x3c   : > { %326 = vperm.xlu1 %647, %v199_v23   ;;  %321 = vperm.xlu0 %646, %v198_v24  }
  0x40   : > { %336 = vperm.xlu1 %647, %v201_v25   ;;  %331 = vperm.xlu0 %646, %v200_v26  }
  0x44   : > { %346 = vperm.xlu1 %647, %v203_v27   ;;  %341 = vperm.xlu0 %646, %v202_v28  }
  0x48   : > { %356 = vperm.xlu1 %647, %v205_v29   ;;  %351 = vperm.xlu0 %646, %v204_v30  }
  0x4c   : > { %366 = vperm.xlu1 %647, %v207_v31   ;;  %361 = vperm.xlu0 %646, %v206_v32  }
  0x8b   : > { %v222_v35 = vpop.permute.xlu1 %221  ;;  %v212_v36 = vpop.permute.xlu0 %211 }
  0x8c   : > { %v377_v37 = vsub.f32 %v222_v35, %v797_v33  ;;  %v375_v38 = vsub.f32 %v212_v36, %v797_v33 }
  0x8e   : > { %v410_v39 = vmul.f32 %v799_v34, %v377_v37  ;;  %v408_v40 = vmul.f32 %v799_v34, %v375_v38 }
  0x8f   : > { %v227_v41 = vpop.permute.xlu1 %226  ;;  %v217_v42 = vpop.permute.xlu0 %216 }
  0x90   : > { %v442_v43 = vmul.f32 %v410_v39, %v377_v37  ;;  %v440_v44 = vmul.f32 %v408_v40, %v375_v38  ;;  %v378_v45 = vsub.f32 %v227_v41, %v797_v33  ;;  %v376_v46 = vsub.f32 %v217_v42, %v797_v33 }
  0x92   : > { %v476_v47 = vmul.f32 1.442695, %v442_v43  ;;  %v472_v48 = vmul.f32 1.442695, %v440_v44  ;;  %v411_v49 = vmul.f32 %v799_v34, %v378_v45  ;;  %v409_v50 = vmul.f32 %v799_v34, %v376_v46 }
  0x93   : > { %v237_v51 = vpop.permute.xlu1 %236  ;;  %v232_v52 = vpop.permute.xlu0 %231 }
  0x94   : > { %648 = vpow2.f32 %v476_v47  ;;  %v443_v53 = vmul.f32 %v411_v49, %v378_v45  ;;  %v441_v54 = vmul.f32 %v409_v50, %v376_v46  ;;  %v380_v55 = vsub.f32 %v237_v51, %v797_v33 }
  0x95   : > { %650 = vpow2.f32 %v472_v48  ;;  %v379_v56 = vsub.f32 %v232_v52, %v797_v33 }
  0x96   : > { %v478_v57 = vmul.f32 1.442695, %v443_v53  ;;  %v474_v58 = vmul.f32 1.442695, %v441_v54  ;;  %v413_v59 = vmul.f32 %v799_v34, %v380_v55 }
  0x97   : > { %v412_v60 = vmul.f32 %v799_v34, %v379_v56  ;;  %v247_v61 = vpop.permute.xlu1 %246  ;;  %v242_v62 = vpop.permute.xlu0 %241 }
  0x98   : > { %652 = vpow2.f32 %v478_v57  ;;  %v445_v63 = vmul.f32 %v413_v59, %v380_v55  ;;  %v382_v0 = vsub.f32 %v247_v61, %v797_v33  ;;  %v381_v1 = vsub.f32 %v242_v62, %v797_v33 }
  0x99   : > { %654 = vpow2.f32 %v474_v58  ;;  %v444_v2 = vmul.f32 %v412_v60, %v379_v56 }
  0x9a   : > { %v482_v3 = vmul.f32 1.442695, %v445_v63  ;;  %v415_v4 = vmul.f32 %v799_v34, %v382_v0  ;;  %v414_v5 = vmul.f32 %v799_v34, %v381_v1 }
  0x9b   : > { %v480_v6 = vmul.f32 1.442695, %v444_v2  ;;  %v257_v7 = vpop.permute.xlu1 %256  ;;  %v252_v8 = vpop.permute.xlu0 %251 }
  0x9c   : > { %656 = vpow2.f32 %v482_v3  ;;  %v447_v9 = vmul.f32 %v415_v4, %v382_v0  ;;  %v446_v10 = vmul.f32 %v414_v5, %v381_v1  ;;  %v384_v11 = vsub.f32 %v257_v7, %v797_v33 }
  0x9d   : > { %658 = vpow2.f32 %v480_v6  ;;  %v383_v12 = vsub.f32 %v252_v8, %v797_v33 }
  0x9e   : > { %v486_v13 = vmul.f32 1.442695, %v447_v9  ;;  %v484_v14 = vmul.f32 1.442695, %v446_v10  ;;  %v417_v15 = vmul.f32 %v799_v34, %v384_v11 }
  0x9f   : > { %v416_v16 = vmul.f32 %v799_v34, %v383_v12  ;;  %v267_v17 = vpop.permute.xlu1 %266  ;;  %v262_v18 = vpop.permute.xlu0 %261 }
  0xa0   : > { %660 = vpow2.f32 %v486_v13  ;;  %v449_v19 = vmul.f32 %v417_v15, %v384_v11  ;;  %v386_v20 = vsub.f32 %v267_v17, %v797_v33  ;;  %v385_v21 = vsub.f32 %v262_v18, %v797_v33 }
  0xa1   : > { %v649_v22 = vpop.eup %648  ;;  %662 = vpow2.f32 %v484_v14  ;;  %v448_v23 = vmul.f32 %v416_v16, %v383_v12 }
  0xa2   : > { %v651_v24 = vpop.eup %650  ;;  %539 = vst.msk [vmem:[%s825_s25 + $0x10] sm:$0xff] %vm536_vm0, %v649_v22  ;;  %v490_v25 = vmul.f32 1.442695, %v449_v19  ;;  %v419_v26 = vmul.f32 %v799_v34, %v386_v20  ;;  %v418_v27 = vmul.f32 %v799_v34, %v385_v21 }
  0xa3   : > { %537 = vst.msk [vmem:[%s825_s25] sm:$0xff] %vm536_vm0, %v651_v24  ;;  %v488_v28 = vmul.f32 1.442695, %v448_v23  ;;  %v277_v29 = vpop.permute.xlu1 %276  ;;  %v272_v30 = vpop.permute.xlu0 %271 }
  0xa4   : > { %664 = vpow2.f32 %v490_v25  ;;  %v451_v31 = vmul.f32 %v419_v26, %v386_v20  ;;  %v450_v32 = vmul.f32 %v418_v27, %v385_v21  ;;  %v388_v35 = vsub.f32 %v277_v29, %v797_v33 }
  0xa5   : > { %v653_v36 = vpop.eup %652  ;;  %666 = vpow2.f32 %v488_v28  ;;  %v387_v37 = vsub.f32 %v272_v30, %v797_v33 }
  0xa6   : > { %v655_v38 = vpop.eup %654  ;;  %540 = vst.msk [vmem:[%s825_s25 + $0x18] sm:$0xff] %vm536_vm0, %v653_v36  ;;  %v494_v39 = vmul.f32 1.442695, %v451_v31  ;;  %v492_v40 = vmul.f32 1.442695, %v450_v32  ;;  %v421_v41 = vmul.f32 %v799_v34, %v388_v35 }
  0xa7   : > { %538 = vst.msk [vmem:[%s825_s25 + $0x8] sm:$0xff] %vm536_vm0, %v655_v38  ;;  %v420_v42 = vmul.f32 %v799_v34, %v387_v37  ;;  %v287_v43 = vpop.permute.xlu1 %286  ;;  %v282_v44 = vpop.permute.xlu0 %281 }
  0xa8   : > { %668 = vpow2.f32 %v494_v39  ;;  %v453_v45 = vmul.f32 %v421_v41, %v388_v35  ;;  %v390_v46 = vsub.f32 %v287_v43, %v797_v33  ;;  %v389_v47 = vsub.f32 %v282_v44, %v797_v33 }
  0xa9   : > { %v657_v48 = vpop.eup %656  ;;  %670 = vpow2.f32 %v492_v40  ;;  %v452_v49 = vmul.f32 %v420_v42, %v387_v37 }
  0xaa   : > { %v659_v50 = vpop.eup %658  ;;  %542 = vst.msk [vmem:[%s825_s25 + $0x28] sm:$0xff] %vm536_vm0, %v657_v48  ;;  %v498_v51 = vmul.f32 1.442695, %v453_v45  ;;  %v423_v52 = vmul.f32 %v799_v34, %v390_v46  ;;  %v422_v53 = vmul.f32 %v799_v34, %v389_v47 }
  0xab   : > { %541 = vst.msk [vmem:[%s825_s25 + $0x20] sm:$0xff] %vm536_vm0, %v659_v50  ;;  %v496_v54 = vmul.f32 1.442695, %v452_v49  ;;  %v297_v55 = vpop.permute.xlu1 %296  ;;  %v292_v56 = vpop.permute.xlu0 %291 }
  0xac   : > { %672 = vpow2.f32 %v498_v51  ;;  %v455_v57 = vmul.f32 %v423_v52, %v390_v46  ;;  %v454_v58 = vmul.f32 %v422_v53, %v389_v47  ;;  %v392_v59 = vsub.f32 %v297_v55, %v797_v33 }
  0xad   : > { %v661_v60 = vpop.eup %660  ;;  %674 = vpow2.f32 %v496_v54  ;;  %v391_v61 = vsub.f32 %v292_v56, %v797_v33 }
  0xae   : > { %v663_v62 = vpop.eup %662  ;;  %544 = vst.msk [vmem:[%s825_s25 + $0x38] sm:$0xff] %vm536_vm0, %v661_v60  ;;  %v502_v63 = vmul.f32 1.442695, %v455_v57  ;;  %v500_v0 = vmul.f32 1.442695, %v454_v58  ;;  %v425_v1 = vmul.f32 %v799_v34, %v392_v59 }
  0xaf   : > { %543 = vst.msk [vmem:[%s825_s25 + $0x30] sm:$0xff] %vm536_vm0, %v663_v62  ;;  %v424_v2 = vmul.f32 %v799_v34, %v391_v61  ;;  %v307_v3 = vpop.permute.xlu1 %306  ;;  %v302_v4 = vpop.permute.xlu0 %301 }
  0xb0   : > { %676 = vpow2.f32 %v502_v63  ;;  %v457_v5 = vmul.f32 %v425_v1, %v392_v59  ;;  %v394_v6 = vsub.f32 %v307_v3, %v797_v33  ;;  %v393_v7 = vsub.f32 %v302_v4, %v797_v33 }
  0xb1   : > { %v665_v8 = vpop.eup %664  ;;  %678 = vpow2.f32 %v500_v0  ;;  %v456_v9 = vmul.f32 %v424_v2, %v391_v61 }
  0xb2   : > { %v667_v10 = vpop.eup %666  ;;  %546 = vst.msk [vmem:[%s825_s25 + $0x48] sm:$0xff] %vm536_vm0, %v665_v8  ;;  %v506_v11 = vmul.f32 1.442695, %v457_v5  ;;  %v427_v12 = vmul.f32 %v799_v34, %v394_v6  ;;  %v426_v13 = vmul.f32 %v799_v34, %v393_v7 }
  0xb3   : > { %545 = vst.msk [vmem:[%s825_s25 + $0x40] sm:$0xff] %vm536_vm0, %v667_v10  ;;  %v504_v14 = vmul.f32 1.442695, %v456_v9  ;;  %v317_v15 = vpop.permute.xlu1 %316  ;;  %v312_v16 = vpop.permute.xlu0 %311 }
  0xb4   : > { %680 = vpow2.f32 %v506_v11  ;;  %v459_v17 = vmul.f32 %v427_v12, %v394_v6  ;;  %v458_v18 = vmul.f32 %v426_v13, %v393_v7  ;;  %v396_v19 = vsub.f32 %v317_v15, %v797_v33 }
  0xb5   : > { %v669_v20 = vpop.eup %668  ;;  %682 = vpow2.f32 %v504_v14  ;;  %v395_v21 = vsub.f32 %v312_v16, %v797_v33 }
  0xb6   : > { %v671_v22 = vpop.eup %670  ;;  %548 = vst.msk [vmem:[%s825_s25 + $0x58] sm:$0xff] %vm536_vm0, %v669_v20  ;;  %v510_v23 = vmul.f32 1.442695, %v459_v17  ;;  %v508_v24 = vmul.f32 1.442695, %v458_v18  ;;  %v429_v25 = vmul.f32 %v799_v34, %v396_v19 }
  0xb7   : > { %547 = vst.msk [vmem:[%s825_s25 + $0x50] sm:$0xff] %vm536_vm0, %v671_v22  ;;  %v428_v26 = vmul.f32 %v799_v34, %v395_v21  ;;  %v327_v27 = vpop.permute.xlu1 %326  ;;  %v322_v28 = vpop.permute.xlu0 %321 }
  0xb8   : > { %684 = vpow2.f32 %v510_v23  ;;  %v461_v29 = vmul.f32 %v429_v25, %v396_v19  ;;  %v398_v30 = vsub.f32 %v327_v27, %v797_v33  ;;  %v397_v31 = vsub.f32 %v322_v28, %v797_v33 }
  0xb9   : > { %v673_v32 = vpop.eup %672  ;;  %686 = vpow2.f32 %v508_v24  ;;  %v460_v35 = vmul.f32 %v428_v26, %v395_v21 }
  0xba   : > { %v675_v36 = vpop.eup %674  ;;  %550 = vst.msk [vmem:[%s825_s25 + $0x68] sm:$0xff] %vm536_vm0, %v673_v32  ;;  %v514_v37 = vmul.f32 1.442695, %v461_v29  ;;  %v431_v38 = vmul.f32 %v799_v34, %v398_v30  ;;  %v430_v39 = vmul.f32 %v799_v34, %v397_v31 }
  0xbb   : > { %549 = vst.msk [vmem:[%s825_s25 + $0x60] sm:$0xff] %vm536_vm0, %v675_v36  ;;  %v512_v40 = vmul.f32 1.442695, %v460_v35  ;;  %v337_v41 = vpop.permute.xlu1 %336  ;;  %v332_v42 = vpop.permute.xlu0 %331 }
  0xbc   : > { %688 = vpow2.f32 %v514_v37  ;;  %v463_v43 = vmul.f32 %v431_v38, %v398_v30  ;;  %v462_v44 = vmul.f32 %v430_v39, %v397_v31  ;;  %v400_v45 = vsub.f32 %v337_v41, %v797_v33 }
  0xbd   : > { %v677_v46 = vpop.eup %676  ;;  %690 = vpow2.f32 %v512_v40  ;;  %v399_v47 = vsub.f32 %v332_v42, %v797_v33 }
  0xbe   : > { %v679_v48 = vpop.eup %678  ;;  %552 = vst.msk [vmem:[%s825_s25 + $0x78] sm:$0xff] %vm536_vm0, %v677_v46  ;;  %v518_v49 = vmul.f32 1.442695, %v463_v43  ;;  %v516_v50 = vmul.f32 1.442695, %v462_v44  ;;  %v433_v51 = vmul.f32 %v799_v34, %v400_v45 }
  0xbf   : > { %551 = vst.msk [vmem:[%s825_s25 + $0x70] sm:$0xff] %vm536_vm0, %v679_v48  ;;  %v432_v52 = vmul.f32 %v799_v34, %v399_v47  ;;  %v347_v53 = vpop.permute.xlu1 %346  ;;  %v342_v54 = vpop.permute.xlu0 %341 }
  0xc0   : > { %692 = vpow2.f32 %v518_v49  ;;  %v465_v55 = vmul.f32 %v433_v51, %v400_v45  ;;  %v402_v56 = vsub.f32 %v347_v53, %v797_v33  ;;  %v401_v57 = vsub.f32 %v342_v54, %v797_v33 }
  0xc1   : > { %v681_v58 = vpop.eup %680  ;;  %694 = vpow2.f32 %v516_v50  ;;  %v464_v59 = vmul.f32 %v432_v52, %v399_v47 }
  0xc2   : > { %v683_v60 = vpop.eup %682  ;;  %554 = vst.msk [vmem:[%s825_s25 + $0x88] sm:$0xff] %vm536_vm0, %v681_v58  ;;  %v522_v61 = vmul.f32 1.442695, %v465_v55  ;;  %v435_v62 = vmul.f32 %v799_v34, %v402_v56  ;;  %v434_v63 = vmul.f32 %v799_v34, %v401_v57 }
  0xc3   : > { %553 = vst.msk [vmem:[%s825_s25 + $0x80] sm:$0xff] %vm536_vm0, %v683_v60  ;;  %v520_v0 = vmul.f32 1.442695, %v464_v59  ;;  %v357_v1 = vpop.permute.xlu1 %356  ;;  %v352_v2 = vpop.permute.xlu0 %351 }
  0xc4   : > { %696 = vpow2.f32 %v522_v61  ;;  %v467_v3 = vmul.f32 %v435_v62, %v402_v56  ;;  %v466_v4 = vmul.f32 %v434_v63, %v401_v57  ;;  %v404_v5 = vsub.f32 %v357_v1, %v797_v33 }
  0xc5   : > { %v685_v6 = vpop.eup %684  ;;  %698 = vpow2.f32 %v520_v0  ;;  %v403_v7 = vsub.f32 %v352_v2, %v797_v33 }
  0xc6   : > { %v687_v8 = vpop.eup %686  ;;  %556 = vst.msk [vmem:[%s825_s25 + $0x98] sm:$0xff] %vm536_vm0, %v685_v6  ;;  %v526_v9 = vmul.f32 1.442695, %v467_v3  ;;  %v524_v10 = vmul.f32 1.442695, %v466_v4  ;;  %v437_v11 = vmul.f32 %v799_v34, %v404_v5 }
  0xc7   : > { %555 = vst.msk [vmem:[%s825_s25 + $0x90] sm:$0xff] %vm536_vm0, %v687_v8  ;;  %v436_v12 = vmul.f32 %v799_v34, %v403_v7  ;;  %v367_v13 = vpop.permute.xlu1 %366  ;;  %v362_v14 = vpop.permute.xlu0 %361 }
  0xc8   : > { %700 = vpow2.f32 %v526_v9  ;;  %v469_v15 = vmul.f32 %v437_v11, %v404_v5  ;;  %v406_v16 = vsub.f32 %v367_v13, %v797_v33  ;;  %v405_v17 = vsub.f32 %v362_v14, %v797_v33 }
  0xc9   : > { %v689_v18 = vpop.eup %688  ;;  %702 = vpow2.f32 %v524_v10  ;;  %v468_v19 = vmul.f32 %v436_v12, %v403_v7 }
  0xca   : > { %v691_v20 = vpop.eup %690  ;;  %558 = vst.msk [vmem:[%s825_s25 + $0xa8] sm:$0xff] %vm536_vm0, %v689_v18  ;;  %v530_v21 = vmul.f32 1.442695, %v469_v15  ;;  %v439_v22 = vmul.f32 %v799_v34, %v406_v16  ;;  %v438_v23 = vmul.f32 %v799_v34, %v405_v17 }
  0xcb   : > { %557 = vst.msk [vmem:[%s825_s25 + $0xa0] sm:$0xff] %vm536_vm0, %v691_v20  ;;  %v528_v24 = vmul.f32 1.442695, %v468_v19 }
  0xcc   : > { %704 = vpow2.f32 %v530_v21  ;;  %v471_v33 = vmul.f32 %v439_v22, %v406_v16  ;;  %v470_v25 = vmul.f32 %v438_v23, %v405_v17 }
  0xcd   : > { %v693_v26 = vpop.eup %692  ;;  %706 = vpow2.f32 %v528_v24 }
  0xce   : > { %v695_v27 = vpop.eup %694  ;;  %560 = vst.msk [vmem:[%s825_s25 + $0xb8] sm:$0xff] %vm536_vm0, %v693_v26  ;;  %v534_v28 = vmul.f32 1.442695, %v471_v33  ;;  %v532_v29 = vmul.f32 1.442695, %v470_v25 }
  0xcf   : > { %559 = vst.msk [vmem:[%s825_s25 + $0xb0] sm:$0xff] %vm536_vm0, %v695_v27 }
  0xd0   : > { %708 = vpow2.f32 %v534_v28 }
  0xd1   : > { %v697_v34 = vpop.eup %696  ;;  %710 = vpow2.f32 %v532_v29 }
  0xd2   : > { %v699_v30 = vpop.eup %698  ;;  %562 = vst.msk [vmem:[%s825_s25 + $0xc8] sm:$0xff] %vm536_vm0, %v697_v34 }
  0xd3   : > { %561 = vst.msk [vmem:[%s825_s25 + $0xc0] sm:$0xff] %vm536_vm0, %v699_v30 }
  0xd5   : > { %v701_v31 = vpop.eup %700 }
  0xd6   : > { %v703_v32 = vpop.eup %702  ;;  %564 = vst.msk [vmem:[%s825_s25 + $0xd8] sm:$0xff] %vm536_vm0, %v701_v31 }
  0xd7   : > { %563 = vst.msk [vmem:[%s825_s25 + $0xd0] sm:$0xff] %vm536_vm0, %v703_v32 }
  0xd9   : > { %v705_v35 = vpop.eup %704 }
  0xda   : > { %v707_v36 = vpop.eup %706  ;;  %566 = vst.msk [vmem:[%s825_s25 + $0xe8] sm:$0xff] %vm536_vm0, %v705_v35 }
  0xdb   : > { %565 = vst.msk [vmem:[%s825_s25 + $0xe0] sm:$0xff] %vm536_vm0, %v707_v36 }
  0xdd   : > { %v709_v37 = vpop.eup %708 }
  0xde   : > { %v711_v38 = vpop.eup %710  ;;  %568 = vst.msk [vmem:[%s825_s25 + $0xf8] sm:$0xff] %vm536_vm0, %v709_v37 }
  0xdf   : > { %567 = vst.msk [vmem:[%s825_s25 + $0xf0] sm:$0xff] %vm536_vm0, %v711_v38 }
  0xe0 PF: > { %s14_s14 = sadd.s32 1, %s718_s14  }
  0xe1   : > { %p11_p4 = scmp.ge.s32.totalorder %s14_s14, 4  }
  0xe3   :  { %13 = sbr.rel (!%p11_p4) target bundleno = 2 (0x2), region = 62 }

</bundles_post_ra>
